<compile_context>
chip_gen: v5e
topology: v5e:2x2
jax: 0.10.0
libtpu: 0.0.40
codegen_flags: <defaults>
</compile_context>

<pallas_src>
import functools

import jax
import jax.numpy as jnp
from jax.experimental import pallas as pl
from jax.experimental.pallas import tpu as pltpu


_LANES = 128


def _round_up(a, b):
    return ((a + b - 1) // b) * b


def _conv2d_kernel(kflat_ref, x_ref, o_ref, *, C_out, C_in, Hs, K, pad, Lpad, co_tile):
    """One packed block per grid step.

    kflat_ref : SMEM (C_out*C_in*K*K,) f32     fixed conv weights, flattened OIHW
    x_ref     : VMEM (1, C_in, Hs+2*pad, Lpad) packed activations; segment g's data lives at
                lanes [g*S, g*S+W); gutter lanes [g*S+W, (g+1)*S) and slack lanes are zero.
    o_ref     : VMEM (1, C_out, Hs, Lpad)      packed outputs (gutter lanes hold junk; the
                                               wrapper unpack discards them).
    """
    # C_out tiled in groups to bound accumulator vreg live ranges; the XLU rolls are rebuilt
    # per group (cheap) while the dominating VALU multiply-adds are unchanged.
    for co0 in range(0, C_out, co_tile):
        cos = list(range(co0, min(co0 + co_tile, C_out)))
        accs = [jnp.zeros((Hs, Lpad), jnp.float32) for _ in cos]
        for ci in range(C_in):
            slab = x_ref[0, ci].astype(jnp.float32)            # (Hs+2*pad, Lpad), cast once
            # Hoisted lane shifts (XLU slot): shifted[kw][r, l] == slab[r, l + kw - pad];
            # lanes shifted in from outside a segment are zeros (gutter / slack wrap-around).
            shifted = []
            for kw in range(K):
                sh = (pad - kw) % Lpad
                shifted.append(slab if sh == 0 else pltpu.roll(slab, shift=sh, axis=1))
            for kh in range(K):
                for kw in range(K):
                    patch = shifted[kw][kh:kh + Hs, :]         # sublane slice, once per tap
                    for j, co in enumerate(cos):               # patch reused across C_out
                        w = kflat_ref[((co * C_in + ci) * K + kh) * K + kw]
                        accs[j] = accs[j] + w * patch
        for j, co in enumerate(cos):
            # Full lane-width store -> unmasked vst (lane-dense output).
            o_ref[0, co, :, :] = accs[j].astype(o_ref.dtype)


def _choose_packing(N, H, W, pad):
    """Pick row-strip height and segments-per-block for lane-dense packing."""
    S = W + 2 * pad                           # segment lane stride (data W + 2*pad gutter)
    G_full = max(1, _LANES // S)              # segments that fit in 128 lanes
    Hs_cap = 32                               # cap strip height (vreg live-range / VMEM bound)
    if N >= G_full:
        ns_lanes = 1                          # enough images to fill the lanes already
    else:
        ns_lanes = max(1, min(G_full // N, pl.cdiv(H, 8)))   # split rows, keep strips >= ~8 rows
    NS = max(pl.cdiv(H, Hs_cap), ns_lanes)    # strips per image
    Hs = pl.cdiv(H, NS)                       # strip height
    NS = pl.cdiv(H, Hs)                       # re-derive (drop empty strips)
    T = N * NS                                # total segments
    G_blk = min(G_full, T)                    # segments packed per grid step
    NB = pl.cdiv(T, G_blk)                    # grid length
    Lpad = _round_up(G_blk * S, _LANES)       # lane width of a packed block
    return S, NS, Hs, T, G_blk, NB, Lpad


def fixed_conv2d(x, kernel):
    """Equivalent of FixedConv2dLayer(kernel)(x).

    x      : (N, C_in, H, W)
    kernel : up to 4-D; trailing two dims square & odd (unsqueezed to (C_out, C_in, K, K))
    """
    # --- replicate FixedConv2dLayer.__init__ semantics (glue, plain JAX) ---
    if kernel.shape[-1] != kernel.shape[-2]:
        raise ValueError("non square kernels not yet supported")
    if kernel.shape[-1] % 2 == 0:
        raise ValueError("even sized kernels not yet supported")
    while kernel.ndim < 4:
        kernel = kernel[None]
    C_out, C_in_k, K, _ = kernel.shape
    pad = (K - 1) // 2

    N, C_in, H, W = x.shape
    assert C_in == C_in_k, "input channels must match kernel's in-channels"

    S, NS, Hs, T, G_blk, NB, Lpad = _choose_packing(N, H, W, pad)
    Hsp = Hs + 2 * pad
    # Invariant the kernel relies on: inside every packed block, gutter lanes [g*S+W, (g+1)*S)
    # and slack lanes [G_blk*S, Lpad) are zero, so +-pad lane rolls only ever pull in zeros.
    assert Lpad >= G_blk * S and S == W + 2 * pad

    # --- resource guards (explicit failure beats a mysterious compile error) ---
    try:
        vmem_cap = int(pltpu.get_tpu_info().vmem_capacity_bytes)
    except Exception:
        vmem_cap = 64 << 20                   # conservative fallback (v7x per-TC VMEM)
    vmem_budget = (vmem_cap * 3) // 4         # ~48 MiB on v7x, ~96 MiB on v5e/v6e
    itemsize = jnp.dtype(x.dtype).itemsize
    blk_bytes = (C_in * Hsp + C_out * Hs) * Lpad * itemsize
    vmem_need = 2 * blk_bytes + (2 << 20)     # double-buffered in+out blocks + slack
    if vmem_need > vmem_budget:
        raise NotImplementedError("packed block too large for per-step VMEM budget")
    if C_out * C_in * K * K * 4 > (256 << 10):
        raise NotImplementedError("kernel too large for SMEM scalar path")

    # --- wrapper-side lane packing (layout plumbing only; keeps the DMA and stores dense) ---
    # pad rows up to NS*Hs and add the vertical conv halo once
    xh = jnp.pad(x, ((0, 0), (0, 0), (pad, NS * Hs - H + pad), (0, 0)))
    # NS overlapping strips of Hsp rows each (static slices), flattened into a segment pool
    seg = jnp.stack([xh[:, :, s * Hs:s * Hs + Hsp, :] for s in range(NS)], axis=1)
    seg = seg.reshape(T, C_in, Hsp, W)
    # pad the pool to NB*G_blk segments and append each segment's 2*pad zero lane gutter
    seg = jnp.pad(seg, ((0, NB * G_blk - T), (0, 0), (0, 0), (0, S - W)))
    # pack G_blk segments side-by-side along lanes; round lane width up to a multiple of 128
    seg = seg.reshape(NB, G_blk, C_in, Hsp, S).transpose(0, 2, 3, 1, 4)
    seg = seg.reshape(NB, C_in, Hsp, G_blk * S)
    xp = jnp.pad(seg, ((0, 0), (0, 0), (0, 0), (0, Lpad - G_blk * S)))

    kflat = kernel.reshape(-1).astype(jnp.float32)

    body = functools.partial(
        _conv2d_kernel, C_out=C_out, C_in=C_in, Hs=Hs, K=K, pad=pad, Lpad=Lpad,
        co_tile=min(C_out, 4))

    yp = pl.pallas_call(
        body,
        out_shape=jax.ShapeDtypeStruct((NB, C_out, Hs, Lpad), x.dtype),
        grid=(NB,),
        in_specs=[
            pl.BlockSpec(memory_space=pltpu.MemorySpace.SMEM),             # flat weights
            pl.BlockSpec((1, C_in, Hsp, Lpad), lambda b: (b, 0, 0, 0)),    # packed activations
        ],
        out_specs=pl.BlockSpec((1, C_out, Hs, Lpad), lambda b: (b, 0, 0, 0)),
        compiler_params=pltpu.CompilerParams(
            dimension_semantics=("parallel",),
            vmem_limit_bytes=int(min(vmem_budget, max(vmem_need + (8 << 20), 32 << 20))),
        ),
    )(kflat, xp)

    # --- unpack the lane-packed output back to (N, C_out, H, W) ---
    y = yp[..., :G_blk * S].reshape(NB, C_out, Hs, G_blk, S)[..., :W]
    y = y.transpose(0, 3, 1, 2, 4).reshape(NB * G_blk, C_out, Hs, W)
    y = y[:T].reshape(N, NS, C_out, Hs, W).transpose(0, 2, 1, 3, 4)
    return y.reshape(N, C_out, NS * Hs, W)[:, :, :H, :]


def _reference_conv2d(x, kernel, pad):
    return jax.lax.conv_general_dilated(
        x, kernel,
        window_strides=(1, 1),
        padding=[(pad, pad), (pad, pad)],
        dimension_numbers=("NCHW", "OIHW", "NCHW"),
    )


if __name__ == "__main__":
    key = jax.random.PRNGKey(0)
    kx, kw_key = jax.random.split(key)

    # Small deterministic example: batch=2, C_in=4, 16x16 spatial, C_out=2, 3x3 kernel.
    N, C_in, H, W = 2, 4, 16, 16
    C_out, K = 2, 3

    x = jax.random.normal(kx, (N, C_in, H, W), dtype=jnp.float32)
    kernel = jax.random.normal(kw_key, (C_out, C_in, K, K), dtype=jnp.float32)

    fixed_conv2d_jit = jax.jit(fixed_conv2d)
    out = jax.block_until_ready(fixed_conv2d_jit(x, kernel))

    ref = _reference_conv2d(x, kernel, (K - 1) // 2)
    assert out.shape == (N, C_out, H, W)
    assert jnp.allclose(out, ref, atol=1e-4, rtol=1e-4), "mismatch vs reference conv"

    print("KERNEL_OK")
</pallas_src>

<mosaic_0001>
module attributes {stable_mosaic.version = 11 : i64} {
  func.func @_conv2d_kernel(%arg0: i32, %arg1: memref<72xf32, #tpu.memory_space<smem>>, %arg2: memref<1x4x10x128xf32, #tpu.memory_space<vmem>>, %arg3: memref<1x2x8x128xf32, #tpu.memory_space<vmem>>) attributes {dimension_semantics = [#tpu.dimension_semantics<parallel>], iteration_bounds = array<i64: 1>, scalar_prefetch = 0 : i64, scratch_operands = 0 : i64, tpu.core_type = #tpu.core_type<tc>, window_params = [{transform_indices = @transform_0, window_bounds = array<i64: 72>}, {transform_indices = @transform_1, window_bounds = array<i64: 1, 4, 10, 128>}, {transform_indices = @transform_2, window_bounds = array<i64: 1, 2, 8, 128>}]} {
    %cst = arith.constant 0.000000e+00 : f32
    %0 = vector.broadcast %cst : f32 to vector<8x128xf32>
    %cst_0 = arith.constant 0.000000e+00 : f32
    %1 = vector.broadcast %cst_0 : f32 to vector<8x128xf32>
    %c0 = arith.constant 0 : index
    %c0_1 = arith.constant 0 : index
    %c0_2 = arith.constant 0 : index
    %c0_3 = arith.constant 0 : index
    %2 = vector.load %arg2[%c0, %c0_1, %c0_2, %c0_3] : memref<1x4x10x128xf32, #tpu.memory_space<vmem>>, vector<1x1x10x128xf32>
    %3 = vector.shape_cast %2 : vector<1x1x10x128xf32> to vector<10x128xf32>
    %c1_i32 = arith.constant 1 : i32
    %4 = tpu.dynamic_rotate %3 by %c1_i32 dim 1 : vector<10x128xf32>, i32 -> vector<10x128xf32>
    %c127_i32 = arith.constant 127 : i32
    %5 = tpu.dynamic_rotate %3 by %c127_i32 dim 1 : vector<10x128xf32>, i32 -> vector<10x128xf32>
    %6 = vector.extract_strided_slice %4 {offsets = [0, 0], sizes = [8, 128], strides = [1, 1]} : vector<10x128xf32> to vector<8x128xf32>
    %c0_4 = arith.constant 0 : index
    %7 = memref.load %arg1[%c0_4] : memref<72xf32, #tpu.memory_space<smem>>
    %8 = vector.broadcast %7 : f32 to vector<8x128xf32>
    %9 = arith.mulf %8, %6 : vector<8x128xf32>
    %10 = arith.addf %0, %9 : vector<8x128xf32>
    %c36 = arith.constant 36 : index
    %11 = memref.load %arg1[%c36] : memref<72xf32, #tpu.memory_space<smem>>
    %12 = vector.broadcast %11 : f32 to vector<8x128xf32>
    %13 = arith.mulf %12, %6 : vector<8x128xf32>
    %14 = arith.addf %1, %13 : vector<8x128xf32>
    %15 = vector.extract_strided_slice %3 {offsets = [0, 0], sizes = [8, 128], strides = [1, 1]} : vector<10x128xf32> to vector<8x128xf32>
    %c1 = arith.constant 1 : index
    %16 = memref.load %arg1[%c1] : memref<72xf32, #tpu.memory_space<smem>>
    %17 = vector.broadcast %16 : f32 to vector<8x128xf32>
    %18 = arith.mulf %17, %15 : vector<8x128xf32>
    %19 = arith.addf %10, %18 : vector<8x128xf32>
    %c37 = arith.constant 37 : index
    %20 = memref.load %arg1[%c37] : memref<72xf32, #tpu.memory_space<smem>>
    %21 = vector.broadcast %20 : f32 to vector<8x128xf32>
    %22 = arith.mulf %21, %15 : vector<8x128xf32>
    %23 = arith.addf %14, %22 : vector<8x128xf32>
    %24 = vector.extract_strided_slice %5 {offsets = [0, 0], sizes = [8, 128], strides = [1, 1]} : vector<10x128xf32> to vector<8x128xf32>
    %c2 = arith.constant 2 : index
    %25 = memref.load %arg1[%c2] : memref<72xf32, #tpu.memory_space<smem>>
    %26 = vector.broadcast %25 : f32 to vector<8x128xf32>
    %27 = arith.mulf %26, %24 : vector<8x128xf32>
    %28 = arith.addf %19, %27 : vector<8x128xf32>
    %c38 = arith.constant 38 : index
    %29 = memref.load %arg1[%c38] : memref<72xf32, #tpu.memory_space<smem>>
    %30 = vector.broadcast %29 : f32 to vector<8x128xf32>
    %31 = arith.mulf %30, %24 : vector<8x128xf32>
    %32 = arith.addf %23, %31 : vector<8x128xf32>
    %33 = vector.extract_strided_slice %4 {offsets = [1, 0], sizes = [8, 128], strides = [1, 1]} : vector<10x128xf32> to vector<8x128xf32>
    %c3 = arith.constant 3 : index
    %34 = memref.load %arg1[%c3] : memref<72xf32, #tpu.memory_space<smem>>
    %35 = vector.broadcast %34 : f32 to vector<8x128xf32>
    %36 = arith.mulf %35, %33 : vector<8x128xf32>
    %37 = arith.addf %28, %36 : vector<8x128xf32>
    %c39 = arith.constant 39 : index
    %38 = memref.load %arg1[%c39] : memref<72xf32, #tpu.memory_space<smem>>
    %39 = vector.broadcast %38 : f32 to vector<8x128xf32>
    %40 = arith.mulf %39, %33 : vector<8x128xf32>
    %41 = arith.addf %32, %40 : vector<8x128xf32>
    %42 = vector.extract_strided_slice %3 {offsets = [1, 0], sizes = [8, 128], strides = [1, 1]} : vector<10x128xf32> to vector<8x128xf32>
    %c4 = arith.constant 4 : index
    %43 = memref.load %arg1[%c4] : memref<72xf32, #tpu.memory_space<smem>>
    %44 = vector.broadcast %43 : f32 to vector<8x128xf32>
    %45 = arith.mulf %44, %42 : vector<8x128xf32>
    %46 = arith.addf %37, %45 : vector<8x128xf32>
    %c40 = arith.constant 40 : index
    %47 = memref.load %arg1[%c40] : memref<72xf32, #tpu.memory_space<smem>>
    %48 = vector.broadcast %47 : f32 to vector<8x128xf32>
    %49 = arith.mulf %48, %42 : vector<8x128xf32>
    %50 = arith.addf %41, %49 : vector<8x128xf32>
    %51 = vector.extract_strided_slice %5 {offsets = [1, 0], sizes = [8, 128], strides = [1, 1]} : vector<10x128xf32> to vector<8x128xf32>
    %c5 = arith.constant 5 : index
    %52 = memref.load %arg1[%c5] : memref<72xf32, #tpu.memory_space<smem>>
    %53 = vector.broadcast %52 : f32 to vector<8x128xf32>
    %54 = arith.mulf %53, %51 : vector<8x128xf32>
    %55 = arith.addf %46, %54 : vector<8x128xf32>
    %c41 = arith.constant 41 : index
    %56 = memref.load %arg1[%c41] : memref<72xf32, #tpu.memory_space<smem>>
    %57 = vector.broadcast %56 : f32 to vector<8x128xf32>
    %58 = arith.mulf %57, %51 : vector<8x128xf32>
    %59 = arith.addf %50, %58 : vector<8x128xf32>
    %60 = vector.extract_strided_slice %4 {offsets = [2, 0], sizes = [8, 128], strides = [1, 1]} : vector<10x128xf32> to vector<8x128xf32>
    %c6 = arith.constant 6 : index
    %61 = memref.load %arg1[%c6] : memref<72xf32, #tpu.memory_space<smem>>
    %62 = vector.broadcast %61 : f32 to vector<8x128xf32>
    %63 = arith.mulf %62, %60 : vector<8x128xf32>
    %64 = arith.addf %55, %63 : vector<8x128xf32>
    %c42 = arith.constant 42 : index
    %65 = memref.load %arg1[%c42] : memref<72xf32, #tpu.memory_space<smem>>
    %66 = vector.broadcast %65 : f32 to vector<8x128xf32>
    %67 = arith.mulf %66, %60 : vector<8x128xf32>
    %68 = arith.addf %59, %67 : vector<8x128xf32>
    %69 = vector.extract_strided_slice %3 {offsets = [2, 0], sizes = [8, 128], strides = [1, 1]} : vector<10x128xf32> to vector<8x128xf32>
    %c7 = arith.constant 7 : index
    %70 = memref.load %arg1[%c7] : memref<72xf32, #tpu.memory_space<smem>>
    %71 = vector.broadcast %70 : f32 to vector<8x128xf32>
    %72 = arith.mulf %71, %69 : vector<8x128xf32>
    %73 = arith.addf %64, %72 : vector<8x128xf32>
    %c43 = arith.constant 43 : index
    %74 = memref.load %arg1[%c43] : memref<72xf32, #tpu.memory_space<smem>>
    %75 = vector.broadcast %74 : f32 to vector<8x128xf32>
    %76 = arith.mulf %75, %69 : vector<8x128xf32>
    %77 = arith.addf %68, %76 : vector<8x128xf32>
    %78 = vector.extract_strided_slice %5 {offsets = [2, 0], sizes = [8, 128], strides = [1, 1]} : vector<10x128xf32> to vector<8x128xf32>
    %c8 = arith.constant 8 : index
    %79 = memref.load %arg1[%c8] : memref<72xf32, #tpu.memory_space<smem>>
    %80 = vector.broadcast %79 : f32 to vector<8x128xf32>
    %81 = arith.mulf %80, %78 : vector<8x128xf32>
    %82 = arith.addf %73, %81 : vector<8x128xf32>
    %c44 = arith.constant 44 : index
    %83 = memref.load %arg1[%c44] : memref<72xf32, #tpu.memory_space<smem>>
    %84 = vector.broadcast %83 : f32 to vector<8x128xf32>
    %85 = arith.mulf %84, %78 : vector<8x128xf32>
    %86 = arith.addf %77, %85 : vector<8x128xf32>
    %c0_5 = arith.constant 0 : index
    %c1_6 = arith.constant 1 : index
    %c0_7 = arith.constant 0 : index
    %c0_8 = arith.constant 0 : index
    %87 = vector.load %arg2[%c0_5, %c1_6, %c0_7, %c0_8] : memref<1x4x10x128xf32, #tpu.memory_space<vmem>>, vector<1x1x10x128xf32>
    %88 = vector.shape_cast %87 : vector<1x1x10x128xf32> to vector<10x128xf32>
    %c1_i32_9 = arith.constant 1 : i32
    %89 = tpu.dynamic_rotate %88 by %c1_i32_9 dim 1 : vector<10x128xf32>, i32 -> vector<10x128xf32>
    %c127_i32_10 = arith.constant 127 : i32
    %90 = tpu.dynamic_rotate %88 by %c127_i32_10 dim 1 : vector<10x128xf32>, i32 -> vector<10x128xf32>
    %91 = vector.extract_strided_slice %89 {offsets = [0, 0], sizes = [8, 128], strides = [1, 1]} : vector<10x128xf32> to vector<8x128xf32>
    %c9 = arith.constant 9 : index
    %92 = memref.load %arg1[%c9] : memref<72xf32, #tpu.memory_space<smem>>
    %93 = vector.broadcast %92 : f32 to vector<8x128xf32>
    %94 = arith.mulf %93, %91 : vector<8x128xf32>
    %95 = arith.addf %82, %94 : vector<8x128xf32>
    %c45 = arith.constant 45 : index
    %96 = memref.load %arg1[%c45] : memref<72xf32, #tpu.memory_space<smem>>
    %97 = vector.broadcast %96 : f32 to vector<8x128xf32>
    %98 = arith.mulf %97, %91 : vector<8x128xf32>
    %99 = arith.addf %86, %98 : vector<8x128xf32>
    %100 = vector.extract_strided_slice %88 {offsets = [0, 0], sizes = [8, 128], strides = [1, 1]} : vector<10x128xf32> to vector<8x128xf32>
    %c10 = arith.constant 10 : index
    %101 = memref.load %arg1[%c10] : memref<72xf32, #tpu.memory_space<smem>>
    %102 = vector.broadcast %101 : f32 to vector<8x128xf32>
    %103 = arith.mulf %102, %100 : vector<8x128xf32>
    %104 = arith.addf %95, %103 : vector<8x128xf32>
    %c46 = arith.constant 46 : index
    %105 = memref.load %arg1[%c46] : memref<72xf32, #tpu.memory_space<smem>>
    %106 = vector.broadcast %105 : f32 to vector<8x128xf32>
    %107 = arith.mulf %106, %100 : vector<8x128xf32>
    %108 = arith.addf %99, %107 : vector<8x128xf32>
    %109 = vector.extract_strided_slice %90 {offsets = [0, 0], sizes = [8, 128], strides = [1, 1]} : vector<10x128xf32> to vector<8x128xf32>
    %c11 = arith.constant 11 : index
    %110 = memref.load %arg1[%c11] : memref<72xf32, #tpu.memory_space<smem>>
    %111 = vector.broadcast %110 : f32 to vector<8x128xf32>
    %112 = arith.mulf %111, %109 : vector<8x128xf32>
    %113 = arith.addf %104, %112 : vector<8x128xf32>
    %c47 = arith.constant 47 : index
    %114 = memref.load %arg1[%c47] : memref<72xf32, #tpu.memory_space<smem>>
    %115 = vector.broadcast %114 : f32 to vector<8x128xf32>
    %116 = arith.mulf %115, %109 : vector<8x128xf32>
    %117 = arith.addf %108, %116 : vector<8x128xf32>
    %118 = vector.extract_strided_slice %89 {offsets = [1, 0], sizes = [8, 128], strides = [1, 1]} : vector<10x128xf32> to vector<8x128xf32>
    %c12 = arith.constant 12 : index
    %119 = memref.load %arg1[%c12] : memref<72xf32, #tpu.memory_space<smem>>
    %120 = vector.broadcast %119 : f32 to vector<8x128xf32>
    %121 = arith.mulf %120, %118 : vector<8x128xf32>
    %122 = arith.addf %113, %121 : vector<8x128xf32>
    %c48 = arith.constant 48 : index
    %123 = memref.load %arg1[%c48] : memref<72xf32, #tpu.memory_space<smem>>
    %124 = vector.broadcast %123 : f32 to vector<8x128xf32>
    %125 = arith.mulf %124, %118 : vector<8x128xf32>
    %126 = arith.addf %117, %125 : vector<8x128xf32>
    %127 = vector.extract_strided_slice %88 {offsets = [1, 0], sizes = [8, 128], strides = [1, 1]} : vector<10x128xf32> to vector<8x128xf32>
    %c13 = arith.constant 13 : index
    %128 = memref.load %arg1[%c13] : memref<72xf32, #tpu.memory_space<smem>>
    %129 = vector.broadcast %128 : f32 to vector<8x128xf32>
    %130 = arith.mulf %129, %127 : vector<8x128xf32>
    %131 = arith.addf %122, %130 : vector<8x128xf32>
    %c49 = arith.constant 49 : index
    %132 = memref.load %arg1[%c49] : memref<72xf32, #tpu.memory_space<smem>>
    %133 = vector.broadcast %132 : f32 to vector<8x128xf32>
    %134 = arith.mulf %133, %127 : vector<8x128xf32>
    %135 = arith.addf %126, %134 : vector<8x128xf32>
    %136 = vector.extract_strided_slice %90 {offsets = [1, 0], sizes = [8, 128], strides = [1, 1]} : vector<10x128xf32> to vector<8x128xf32>
    %c14 = arith.constant 14 : index
    %137 = memref.load %arg1[%c14] : memref<72xf32, #tpu.memory_space<smem>>
    %138 = vector.broadcast %137 : f32 to vector<8x128xf32>
    %139 = arith.mulf %138, %136 : vector<8x128xf32>
    %140 = arith.addf %131, %139 : vector<8x128xf32>
    %c50 = arith.constant 50 : index
    %141 = memref.load %arg1[%c50] : memref<72xf32, #tpu.memory_space<smem>>
    %142 = vector.broadcast %141 : f32 to vector<8x128xf32>
    %143 = arith.mulf %142, %136 : vector<8x128xf32>
    %144 = arith.addf %135, %143 : vector<8x128xf32>
    %145 = vector.extract_strided_slice %89 {offsets = [2, 0], sizes = [8, 128], strides = [1, 1]} : vector<10x128xf32> to vector<8x128xf32>
    %c15 = arith.constant 15 : index
    %146 = memref.load %arg1[%c15] : memref<72xf32, #tpu.memory_space<smem>>
    %147 = vector.broadcast %146 : f32 to vector<8x128xf32>
    %148 = arith.mulf %147, %145 : vector<8x128xf32>
    %149 = arith.addf %140, %148 : vector<8x128xf32>
    %c51 = arith.constant 51 : index
    %150 = memref.load %arg1[%c51] : memref<72xf32, #tpu.memory_space<smem>>
    %151 = vector.broadcast %150 : f32 to vector<8x128xf32>
    %152 = arith.mulf %151, %145 : vector<8x128xf32>
    %153 = arith.addf %144, %152 : vector<8x128xf32>
    %154 = vector.extract_strided_slice %88 {offsets = [2, 0], sizes = [8, 128], strides = [1, 1]} : vector<10x128xf32> to vector<8x128xf32>
    %c16 = arith.constant 16 : index
    %155 = memref.load %arg1[%c16] : memref<72xf32, #tpu.memory_space<smem>>
    %156 = vector.broadcast %155 : f32 to vector<8x128xf32>
    %157 = arith.mulf %156, %154 : vector<8x128xf32>
    %158 = arith.addf %149, %157 : vector<8x128xf32>
    %c52 = arith.constant 52 : index
    %159 = memref.load %arg1[%c52] : memref<72xf32, #tpu.memory_space<smem>>
    %160 = vector.broadcast %159 : f32 to vector<8x128xf32>
    %161 = arith.mulf %160, %154 : vector<8x128xf32>
    %162 = arith.addf %153, %161 : vector<8x128xf32>
    %163 = vector.extract_strided_slice %90 {offsets = [2, 0], sizes = [8, 128], strides = [1, 1]} : vector<10x128xf32> to vector<8x128xf32>
    %c17 = arith.constant 17 : index
    %164 = memref.load %arg1[%c17] : memref<72xf32, #tpu.memory_space<smem>>
    %165 = vector.broadcast %164 : f32 to vector<8x128xf32>
    %166 = arith.mulf %165, %163 : vector<8x128xf32>
    %167 = arith.addf %158, %166 : vector<8x128xf32>
    %c53 = arith.constant 53 : index
    %168 = memref.load %arg1[%c53] : memref<72xf32, #tpu.memory_space<smem>>
    %169 = vector.broadcast %168 : f32 to vector<8x128xf32>
    %170 = arith.mulf %169, %163 : vector<8x128xf32>
    %171 = arith.addf %162, %170 : vector<8x128xf32>
    %c0_11 = arith.constant 0 : index
    %c2_12 = arith.constant 2 : index
    %c0_13 = arith.constant 0 : index
    %c0_14 = arith.constant 0 : index
    %172 = vector.load %arg2[%c0_11, %c2_12, %c0_13, %c0_14] : memref<1x4x10x128xf32, #tpu.memory_space<vmem>>, vector<1x1x10x128xf32>
    %173 = vector.shape_cast %172 : vector<1x1x10x128xf32> to vector<10x128xf32>
    %c1_i32_15 = arith.constant 1 : i32
    %174 = tpu.dynamic_rotate %173 by %c1_i32_15 dim 1 : vector<10x128xf32>, i32 -> vector<10x128xf32>
    %c127_i32_16 = arith.constant 127 : i32
    %175 = tpu.dynamic_rotate %173 by %c127_i32_16 dim 1 : vector<10x128xf32>, i32 -> vector<10x128xf32>
    %176 = vector.extract_strided_slice %174 {offsets = [0, 0], sizes = [8, 128], strides = [1, 1]} : vector<10x128xf32> to vector<8x128xf32>
    %c18 = arith.constant 18 : index
    %177 = memref.load %arg1[%c18] : memref<72xf32, #tpu.memory_space<smem>>
    %178 = vector.broadcast %177 : f32 to vector<8x128xf32>
    %179 = arith.mulf %178, %176 : vector<8x128xf32>
    %180 = arith.addf %167, %179 : vector<8x128xf32>
    %c54 = arith.constant 54 : index
    %181 = memref.load %arg1[%c54] : memref<72xf32, #tpu.memory_space<smem>>
    %182 = vector.broadcast %181 : f32 to vector<8x128xf32>
    %183 = arith.mulf %182, %176 : vector<8x128xf32>
    %184 = arith.addf %171, %183 : vector<8x128xf32>
    %185 = vector.extract_strided_slice %173 {offsets = [0, 0], sizes = [8, 128], strides = [1, 1]} : vector<10x128xf32> to vector<8x128xf32>
    %c19 = arith.constant 19 : index
    %186 = memref.load %arg1[%c19] : memref<72xf32, #tpu.memory_space<smem>>
    %187 = vector.broadcast %186 : f32 to vector<8x128xf32>
    %188 = arith.mulf %187, %185 : vector<8x128xf32>
    %189 = arith.addf %180, %188 : vector<8x128xf32>
    %c55 = arith.constant 55 : index
    %190 = memref.load %arg1[%c55] : memref<72xf32, #tpu.memory_space<smem>>
    %191 = vector.broadcast %190 : f32 to vector<8x128xf32>
    %192 = arith.mulf %191, %185 : vector<8x128xf32>
    %193 = arith.addf %184, %192 : vector<8x128xf32>
    %194 = vector.extract_strided_slice %175 {offsets = [0, 0], sizes = [8, 128], strides = [1, 1]} : vector<10x128xf32> to vector<8x128xf32>
    %c20 = arith.constant 20 : index
    %195 = memref.load %arg1[%c20] : memref<72xf32, #tpu.memory_space<smem>>
    %196 = vector.broadcast %195 : f32 to vector<8x128xf32>
    %197 = arith.mulf %196, %194 : vector<8x128xf32>
    %198 = arith.addf %189, %197 : vector<8x128xf32>
    %c56 = arith.constant 56 : index
    %199 = memref.load %arg1[%c56] : memref<72xf32, #tpu.memory_space<smem>>
    %200 = vector.broadcast %199 : f32 to vector<8x128xf32>
    %201 = arith.mulf %200, %194 : vector<8x128xf32>
    %202 = arith.addf %193, %201 : vector<8x128xf32>
    %203 = vector.extract_strided_slice %174 {offsets = [1, 0], sizes = [8, 128], strides = [1, 1]} : vector<10x128xf32> to vector<8x128xf32>
    %c21 = arith.constant 21 : index
    %204 = memref.load %arg1[%c21] : memref<72xf32, #tpu.memory_space<smem>>
    %205 = vector.broadcast %204 : f32 to vector<8x128xf32>
    %206 = arith.mulf %205, %203 : vector<8x128xf32>
    %207 = arith.addf %198, %206 : vector<8x128xf32>
    %c57 = arith.constant 57 : index
    %208 = memref.load %arg1[%c57] : memref<72xf32, #tpu.memory_space<smem>>
    %209 = vector.broadcast %208 : f32 to vector<8x128xf32>
    %210 = arith.mulf %209, %203 : vector<8x128xf32>
    %211 = arith.addf %202, %210 : vector<8x128xf32>
    %212 = vector.extract_strided_slice %173 {offsets = [1, 0], sizes = [8, 128], strides = [1, 1]} : vector<10x128xf32> to vector<8x128xf32>
    %c22 = arith.constant 22 : index
    %213 = memref.load %arg1[%c22] : memref<72xf32, #tpu.memory_space<smem>>
    %214 = vector.broadcast %213 : f32 to vector<8x128xf32>
    %215 = arith.mulf %214, %212 : vector<8x128xf32>
    %216 = arith.addf %207, %215 : vector<8x128xf32>
    %c58 = arith.constant 58 : index
    %217 = memref.load %arg1[%c58] : memref<72xf32, #tpu.memory_space<smem>>
    %218 = vector.broadcast %217 : f32 to vector<8x128xf32>
    %219 = arith.mulf %218, %212 : vector<8x128xf32>
    %220 = arith.addf %211, %219 : vector<8x128xf32>
    %221 = vector.extract_strided_slice %175 {offsets = [1, 0], sizes = [8, 128], strides = [1, 1]} : vector<10x128xf32> to vector<8x128xf32>
    %c23 = arith.constant 23 : index
    %222 = memref.load %arg1[%c23] : memref<72xf32, #tpu.memory_space<smem>>
    %223 = vector.broadcast %222 : f32 to vector<8x128xf32>
    %224 = arith.mulf %223, %221 : vector<8x128xf32>
    %225 = arith.addf %216, %224 : vector<8x128xf32>
    %c59 = arith.constant 59 : index
    %226 = memref.load %arg1[%c59] : memref<72xf32, #tpu.memory_space<smem>>
    %227 = vector.broadcast %226 : f32 to vector<8x128xf32>
    %228 = arith.mulf %227, %221 : vector<8x128xf32>
    %229 = arith.addf %220, %228 : vector<8x128xf32>
    %230 = vector.extract_strided_slice %174 {offsets = [2, 0], sizes = [8, 128], strides = [1, 1]} : vector<10x128xf32> to vector<8x128xf32>
    %c24 = arith.constant 24 : index
    %231 = memref.load %arg1[%c24] : memref<72xf32, #tpu.memory_space<smem>>
    %232 = vector.broadcast %231 : f32 to vector<8x128xf32>
    %233 = arith.mulf %232, %230 : vector<8x128xf32>
    %234 = arith.addf %225, %233 : vector<8x128xf32>
    %c60 = arith.constant 60 : index
    %235 = memref.load %arg1[%c60] : memref<72xf32, #tpu.memory_space<smem>>
    %236 = vector.broadcast %235 : f32 to vector<8x128xf32>
    %237 = arith.mulf %236, %230 : vector<8x128xf32>
    %238 = arith.addf %229, %237 : vector<8x128xf32>
    %239 = vector.extract_strided_slice %173 {offsets = [2, 0], sizes = [8, 128], strides = [1, 1]} : vector<10x128xf32> to vector<8x128xf32>
    %c25 = arith.constant 25 : index
    %240 = memref.load %arg1[%c25] : memref<72xf32, #tpu.memory_space<smem>>
    %241 = vector.broadcast %240 : f32 to vector<8x128xf32>
    %242 = arith.mulf %241, %239 : vector<8x128xf32>
    %243 = arith.addf %234, %242 : vector<8x128xf32>
    %c61 = arith.constant 61 : index
    %244 = memref.load %arg1[%c61] : memref<72xf32, #tpu.memory_space<smem>>
    %245 = vector.broadcast %244 : f32 to vector<8x128xf32>
    %246 = arith.mulf %245, %239 : vector<8x128xf32>
    %247 = arith.addf %238, %246 : vector<8x128xf32>
    %248 = vector.extract_strided_slice %175 {offsets = [2, 0], sizes = [8, 128], strides = [1, 1]} : vector<10x128xf32> to vector<8x128xf32>
    %c26 = arith.constant 26 : index
    %249 = memref.load %arg1[%c26] : memref<72xf32, #tpu.memory_space<smem>>
    %250 = vector.broadcast %249 : f32 to vector<8x128xf32>
    %251 = arith.mulf %250, %248 : vector<8x128xf32>
    %252 = arith.addf %243, %251 : vector<8x128xf32>
    %c62 = arith.constant 62 : index
    %253 = memref.load %arg1[%c62] : memref<72xf32, #tpu.memory_space<smem>>
    %254 = vector.broadcast %253 : f32 to vector<8x128xf32>
    %255 = arith.mulf %254, %248 : vector<8x128xf32>
    %256 = arith.addf %247, %255 : vector<8x128xf32>
    %c0_17 = arith.constant 0 : index
    %c3_18 = arith.constant 3 : index
    %c0_19 = arith.constant 0 : index
    %c0_20 = arith.constant 0 : index
    %257 = vector.load %arg2[%c0_17, %c3_18, %c0_19, %c0_20] : memref<1x4x10x128xf32, #tpu.memory_space<vmem>>, vector<1x1x10x128xf32>
    %258 = vector.shape_cast %257 : vector<1x1x10x128xf32> to vector<10x128xf32>
    %c1_i32_21 = arith.constant 1 : i32
    %259 = tpu.dynamic_rotate %258 by %c1_i32_21 dim 1 : vector<10x128xf32>, i32 -> vector<10x128xf32>
    %c127_i32_22 = arith.constant 127 : i32
    %260 = tpu.dynamic_rotate %258 by %c127_i32_22 dim 1 : vector<10x128xf32>, i32 -> vector<10x128xf32>
    %261 = vector.extract_strided_slice %259 {offsets = [0, 0], sizes = [8, 128], strides = [1, 1]} : vector<10x128xf32> to vector<8x128xf32>
    %c27 = arith.constant 27 : index
    %262 = memref.load %arg1[%c27] : memref<72xf32, #tpu.memory_space<smem>>
    %263 = vector.broadcast %262 : f32 to vector<8x128xf32>
    %264 = arith.mulf %263, %261 : vector<8x128xf32>
    %265 = arith.addf %252, %264 : vector<8x128xf32>
    %c63 = arith.constant 63 : index
    %266 = memref.load %arg1[%c63] : memref<72xf32, #tpu.memory_space<smem>>
    %267 = vector.broadcast %266 : f32 to vector<8x128xf32>
    %268 = arith.mulf %267, %261 : vector<8x128xf32>
    %269 = arith.addf %256, %268 : vector<8x128xf32>
    %270 = vector.extract_strided_slice %258 {offsets = [0, 0], sizes = [8, 128], strides = [1, 1]} : vector<10x128xf32> to vector<8x128xf32>
    %c28 = arith.constant 28 : index
    %271 = memref.load %arg1[%c28] : memref<72xf32, #tpu.memory_space<smem>>
    %272 = vector.broadcast %271 : f32 to vector<8x128xf32>
    %273 = arith.mulf %272, %270 : vector<8x128xf32>
    %274 = arith.addf %265, %273 : vector<8x128xf32>
    %c64 = arith.constant 64 : index
    %275 = memref.load %arg1[%c64] : memref<72xf32, #tpu.memory_space<smem>>
    %276 = vector.broadcast %275 : f32 to vector<8x128xf32>
    %277 = arith.mulf %276, %270 : vector<8x128xf32>
    %278 = arith.addf %269, %277 : vector<8x128xf32>
    %279 = vector.extract_strided_slice %260 {offsets = [0, 0], sizes = [8, 128], strides = [1, 1]} : vector<10x128xf32> to vector<8x128xf32>
    %c29 = arith.constant 29 : index
    %280 = memref.load %arg1[%c29] : memref<72xf32, #tpu.memory_space<smem>>
    %281 = vector.broadcast %280 : f32 to vector<8x128xf32>
    %282 = arith.mulf %281, %279 : vector<8x128xf32>
    %283 = arith.addf %274, %282 : vector<8x128xf32>
    %c65 = arith.constant 65 : index
    %284 = memref.load %arg1[%c65] : memref<72xf32, #tpu.memory_space<smem>>
    %285 = vector.broadcast %284 : f32 to vector<8x128xf32>
    %286 = arith.mulf %285, %279 : vector<8x128xf32>
    %287 = arith.addf %278, %286 : vector<8x128xf32>
    %288 = vector.extract_strided_slice %259 {offsets = [1, 0], sizes = [8, 128], strides = [1, 1]} : vector<10x128xf32> to vector<8x128xf32>
    %c30 = arith.constant 30 : index
    %289 = memref.load %arg1[%c30] : memref<72xf32, #tpu.memory_space<smem>>
    %290 = vector.broadcast %289 : f32 to vector<8x128xf32>
    %291 = arith.mulf %290, %288 : vector<8x128xf32>
    %292 = arith.addf %283, %291 : vector<8x128xf32>
    %c66 = arith.constant 66 : index
    %293 = memref.load %arg1[%c66] : memref<72xf32, #tpu.memory_space<smem>>
    %294 = vector.broadcast %293 : f32 to vector<8x128xf32>
    %295 = arith.mulf %294, %288 : vector<8x128xf32>
    %296 = arith.addf %287, %295 : vector<8x128xf32>
    %297 = vector.extract_strided_slice %258 {offsets = [1, 0], sizes = [8, 128], strides = [1, 1]} : vector<10x128xf32> to vector<8x128xf32>
    %c31 = arith.constant 31 : index
    %298 = memref.load %arg1[%c31] : memref<72xf32, #tpu.memory_space<smem>>
    %299 = vector.broadcast %298 : f32 to vector<8x128xf32>
    %300 = arith.mulf %299, %297 : vector<8x128xf32>
    %301 = arith.addf %292, %300 : vector<8x128xf32>
    %c67 = arith.constant 67 : index
    %302 = memref.load %arg1[%c67] : memref<72xf32, #tpu.memory_space<smem>>
    %303 = vector.broadcast %302 : f32 to vector<8x128xf32>
    %304 = arith.mulf %303, %297 : vector<8x128xf32>
    %305 = arith.addf %296, %304 : vector<8x128xf32>
    %306 = vector.extract_strided_slice %260 {offsets = [1, 0], sizes = [8, 128], strides = [1, 1]} : vector<10x128xf32> to vector<8x128xf32>
    %c32 = arith.constant 32 : index
    %307 = memref.load %arg1[%c32] : memref<72xf32, #tpu.memory_space<smem>>
    %308 = vector.broadcast %307 : f32 to vector<8x128xf32>
    %309 = arith.mulf %308, %306 : vector<8x128xf32>
    %310 = arith.addf %301, %309 : vector<8x128xf32>
    %c68 = arith.constant 68 : index
    %311 = memref.load %arg1[%c68] : memref<72xf32, #tpu.memory_space<smem>>
    %312 = vector.broadcast %311 : f32 to vector<8x128xf32>
    %313 = arith.mulf %312, %306 : vector<8x128xf32>
    %314 = arith.addf %305, %313 : vector<8x128xf32>
    %315 = vector.extract_strided_slice %259 {offsets = [2, 0], sizes = [8, 128], strides = [1, 1]} : vector<10x128xf32> to vector<8x128xf32>
    %c33 = arith.constant 33 : index
    %316 = memref.load %arg1[%c33] : memref<72xf32, #tpu.memory_space<smem>>
    %317 = vector.broadcast %316 : f32 to vector<8x128xf32>
    %318 = arith.mulf %317, %315 : vector<8x128xf32>
    %319 = arith.addf %310, %318 : vector<8x128xf32>
    %c69 = arith.constant 69 : index
    %320 = memref.load %arg1[%c69] : memref<72xf32, #tpu.memory_space<smem>>
    %321 = vector.broadcast %320 : f32 to vector<8x128xf32>
    %322 = arith.mulf %321, %315 : vector<8x128xf32>
    %323 = arith.addf %314, %322 : vector<8x128xf32>
    %324 = vector.extract_strided_slice %258 {offsets = [2, 0], sizes = [8, 128], strides = [1, 1]} : vector<10x128xf32> to vector<8x128xf32>
    %c34 = arith.constant 34 : index
    %325 = memref.load %arg1[%c34] : memref<72xf32, #tpu.memory_space<smem>>
    %326 = vector.broadcast %325 : f32 to vector<8x128xf32>
    %327 = arith.mulf %326, %324 : vector<8x128xf32>
    %328 = arith.addf %319, %327 : vector<8x128xf32>
    %c70 = arith.constant 70 : index
    %329 = memref.load %arg1[%c70] : memref<72xf32, #tpu.memory_space<smem>>
    %330 = vector.broadcast %329 : f32 to vector<8x128xf32>
    %331 = arith.mulf %330, %324 : vector<8x128xf32>
    %332 = arith.addf %323, %331 : vector<8x128xf32>
    %333 = vector.extract_strided_slice %260 {offsets = [2, 0], sizes = [8, 128], strides = [1, 1]} : vector<10x128xf32> to vector<8x128xf32>
    %c35 = arith.constant 35 : index
    %334 = memref.load %arg1[%c35] : memref<72xf32, #tpu.memory_space<smem>>
    %335 = vector.broadcast %334 : f32 to vector<8x128xf32>
    %336 = arith.mulf %335, %333 : vector<8x128xf32>
    %337 = arith.addf %328, %336 : vector<8x128xf32>
    %c71 = arith.constant 71 : index
    %338 = memref.load %arg1[%c71] : memref<72xf32, #tpu.memory_space<smem>>
    %339 = vector.broadcast %338 : f32 to vector<8x128xf32>
    %340 = arith.mulf %339, %333 : vector<8x128xf32>
    %341 = arith.addf %332, %340 : vector<8x128xf32>
    %c0_23 = arith.constant 0 : index
    %c0_24 = arith.constant 0 : index
    %c0_25 = arith.constant 0 : index
    %c0_26 = arith.constant 0 : index
    %342 = vector.load %arg3[%c0_23, %c0_24, %c0_25, %c0_26] : memref<1x2x8x128xf32, #tpu.memory_space<vmem>>, vector<1x1x8x128xf32>
    %343 = vector.shape_cast %342 : vector<1x1x8x128xf32> to vector<8x128xf32>
    %344 = vector.shape_cast %337 : vector<8x128xf32> to vector<1x1x8x128xf32>
    tpu.vector_store %arg3[%c0_23, %c0_24, %c0_25, %c0_26], %344 {strides = array<i32>} : memref<1x2x8x128xf32, #tpu.memory_space<vmem>>, vector<1x1x8x128xf32>,
    %c0_27 = arith.constant 0 : index
    %c1_28 = arith.constant 1 : index
    %c0_29 = arith.constant 0 : index
    %c0_30 = arith.constant 0 : index
    %345 = vector.load %arg3[%c0_27, %c1_28, %c0_29, %c0_30] : memref<1x2x8x128xf32, #tpu.memory_space<vmem>>, vector<1x1x8x128xf32>
    %346 = vector.shape_cast %345 : vector<1x1x8x128xf32> to vector<8x128xf32>
    %347 = vector.shape_cast %341 : vector<8x128xf32> to vector<1x1x8x128xf32>
    tpu.vector_store %arg3[%c0_27, %c1_28, %c0_29, %c0_30], %347 {strides = array<i32>} : memref<1x2x8x128xf32, #tpu.memory_space<vmem>>, vector<1x1x8x128xf32>,
    return
  }
  func.func @transform_0(%arg0: i32) -> i32 {
    %c0_i32 = arith.constant 0 : i32
    %c0_i32_0 = arith.constant 0 : i32
    return %c0_i32 : i32
  }
  func.func @transform_1(%arg0: i32) -> (i32, i32, i32, i32) {
    %c0_i32 = arith.constant 0 : i32
    %c0_i32_0 = arith.constant 0 : i32
    %c0_i32_1 = arith.constant 0 : i32
    %c0_i32_2 = arith.constant 0 : i32
    return %arg0, %c0_i32, %c0_i32_0, %c0_i32_1 : i32, i32, i32, i32
  }
  func.func @transform_2(%arg0: i32) -> (i32, i32, i32, i32) {
    %c0_i32 = arith.constant 0 : i32
    %c0_i32_0 = arith.constant 0 : i32
    %c0_i32_1 = arith.constant 0 : i32
    %c0_i32_2 = arith.constant 0 : i32
    return %arg0, %c0_i32, %c0_i32_0, %c0_i32_1 : i32, i32, i32, i32
  }
}

</mosaic_0001>

<bundles_post_ra>
// kernel: fixed_conv2d.1
= control target key start
LH: loop header
LB: loop body
LE: loop exit
PB: predicated region body
PF: predicated region fallthrough
CT: control target
= control target key end

     0   :  { %7 = vsyncpa [#allocation3], 0  ;;  %s796_s12 = smov [#allocation2]   ;;  %s1459_s0 = inlined_call_operand.vmem [shape: f32[72], index: 0, kind: input, shape index: {}]   ;;  %s1460_s1 = inlined_call_operand.vmem [shape: f32[1,4,10,128], index: 1, kind: input, shape index: {}]   ;;  %s1461_s2 = inlined_call_operand.vmem [shape: f32[1,2,8,128], index: 2, kind: output, shape index: {}]  }
   0x1   :  { %s13_s11 = sshll.u32 %s1459_s0, 4  ;;  %s14_s11 = int_to_ptr.vmem [resolvable:$true] %s13_s11 }
   0x2   :  { %16 = dma.vmem_to_smem %s14_s11, 16, %s796_s12, [#allocation3]  }
   0x3   :  { %794 = dma.done.wait [#allocation3], 16  }
   0x4   :  { %795 = vsyncadd [#allocation3], 4294967280 }
   0x5   :  { %23 = sfence }
   0x6   :  { %v820_v0 = vld [vmem:[%s1460_s1] sm:$0xff]  ;;  %s797_s15 = smov 127   ;;  %s798_s16 = smov 1   ;;  %v827_v1 = vld [vmem:[%s1460_s1 + $0x10] sm:$0xff]  ;;  %v25_v2 = vld [vmem:[%s1460_s1 + $0x8] sm:$0x3] }
   0x7   :  { %30 = vrot.lane.b32.xlu1 %v820_v0, %s797_s15  ;;  %26 = vrot.lane.b32.xlu0 %v820_v0, %s798_s16  ;;  %v836_v3 = vld [vmem:[%s1460_s1 + $0x18] sm:$0x3]  ;;  %v844_v4 = vld [vmem:[%s1460_s1 + $0x20] sm:$0xff]  ;;  %s708_s30 = sld [smem:[#allocation2 + $0x4]]  ;;  %vm64_vm0 = vcmask 1046528   ;;  %vm131_vm1 = vcmask 1045504  }
   0x8   :  { %195 = vrot.lane.b32.xlu2 %v827_v1, %s798_s16  ;;  %v850_v5 = vld [vmem:[%s1460_s1 + $0x28] sm:$0x3]  ;;  %v858_v6 = vld [vmem:[%s1460_s1 + $0x30] sm:$0xff]  ;;  %v863_v7 = vld [vmem:[%s1460_s1 + $0x38] sm:$0x3]  ;;  %s869_s3 = sld [smem:[#allocation2 + $0x28]] }
   0x9   :  { %s871_s4 = sld [smem:[#allocation2 + $0x7]] }
   0xa   :  { %s873_s5 = sld [smem:[#allocation2 + $0x2b]] }
   0xb   :  { %s875_s6 = sld [smem:[#allocation2 + $0xd]] }
   0xc   :  { %s877_s7 = sld [smem:[#allocation2 + $0x31]] }
   0xd   :  { %s879_s1 = sld [smem:[#allocation2 + $0x10]]  ;;  %v82_v8 = vstv %s708_s30 }
   0xe   :  { %s881_s8 = sld [smem:[#allocation2 + $0x34]]  ;;  %v903_v9 = vmul.f32 %v82_v8, %v25_v2  ;;  %v93_v10 = vstv %s869_s3  ;;  %v916_v14 = vmul.f32 %v82_v8, %v820_v0 }
   0xf   :  { %32 = vrot.lane.b32.xlu1 %v25_v2, %s797_s15  ;;  %28 = vrot.lane.b32.xlu0 %v25_v2, %s798_s16  ;;  %s883_s9 = sld [smem:[#allocation2 + $0x16]]  ;;  %v149_v11 = vstv %s871_s4  ;;  %v922_v17 = vmul.f32 %v93_v10, %v25_v2  ;;  %v927_v19 = vmul.f32 %v93_v10, %v820_v0 }
  0x10   :  { %197 = vrot.lane.b32.xlu2 %v836_v3, %s798_s16  ;;  %s885_s10 = sld [smem:[#allocation2 + $0x3a]]  ;;  %v160_v12 = vstv %s873_s5  ;;  %v88_v16 = vrot.slane %v903_v9, 1  ;;  %v924_v18 = vmul.f32 %v149_v11, %v25_v2  ;;  %v934_v21 = vmul.f32 %v149_v11, %v820_v0 }
  0x11   :  { %s887_s11 = sld [smem:[#allocation2 + $0x19]]  ;;  %v250_v13 = vstv %s875_s6  ;;  %v931_v20 = vmul.f32 %v160_v12, %v25_v2  ;;  %v99_v32 = vrot.slane %v922_v17, 1  ;;  %v962_v33 = vmul.f32 %v160_v12, %v820_v0 }
  0x12   :  { %s889_s12 = sld [smem:[#allocation2 + $0x3d]]  ;;  %v261_v15 = vstv %s877_s7  ;;  %v937_v22 = vmul.f32 %v827_v1, %v250_v13  ;;  %v943_v24 = vmul.f32 %v836_v3, %v250_v13  ;;  %v155_v36 = vrot.slane %v924_v18, 2 }
  0x13   :  { %s891_s13 = sld [smem:[#allocation2 + $0x2]]  ;;  %v316_v23 = vstv %s879_s1  ;;  %v946_v25 = vmul.f32 %v827_v1, %v261_v15  ;;  %v953_v28 = vmul.f32 %v836_v3, %v261_v15  ;;  %v166_v41 = vrot.slane %v931_v20, 2 }
  0x14   :  { %s893_s14 = sld [smem:[#allocation2 + $0x26]]  ;;  %v327_v26 = vstv %s881_s8  ;;  %v965_v34 = vmul.f32 %v827_v1, %v316_v23  ;;  %v968_v35 = vmul.f32 %v836_v3, %v316_v23  ;;  %v255_v45 = vrot.slane %v937_v22, 1 }
  0x15   :  { %s899_s17 = sld [smem:[#allocation2 + $0x1]]  ;;  %v1465_v27 = vstv %s883_s9  ;;  %v974_v37 = vmul.f32 %v827_v1, %v327_v26  ;;  %v977_v38 = vmul.f32 %v836_v3, %v327_v26  ;;  %v256_v46 = vrot.slane %v943_v24, 1 }
  0x16   :  { %s901_s18 = sld [smem:[#allocation2 + $0x25]]  ;;  %v1464_v29 = vstv %s885_s10  ;;  %v982_v39 = vmul.f32 %v850_v5, %v1465_v27  ;;  %v267_v48 = vrot.slane %v953_v28, 1  ;;  %v98_v57 = vrot.slane %v927_v19, 1 }
  0x17   :  { %201 = vrot.lane.b32.xlu1 %v836_v3, %s797_s15  ;;  %199 = vrot.lane.b32.xlu0 %v827_v1, %s797_s15  ;;  %s905_s0 = sld [smem:[#allocation2 + $0x5]]  ;;  %v1463_v30 = vstv %s887_s11  ;;  %v992_v42 = vmul.f32 %v850_v5, %v1464_v29  ;;  %v154_v29 = vrot.slane %v934_v21, 2  ;;  %v165_v49 = vrot.slane %v962_v33, 2 }
  0x18   :  { %362 = vrot.lane.b32.xlu2 %v844_v4, %s798_s16  ;;  %s909_s19 = sld [smem:[#allocation2 + $0x29]]  ;;  %v1462_v31 = vstv %s889_s12  ;;  %v997_v43 = vmul.f32 %v850_v5, %v1463_v30  ;;  %v1080_v33 = vsel %vm64_vm0, %v98_v57, %v99_v32 }
  0x19   :  { %s913_s20 = sld [smem:[#allocation2 + $0x8]]  ;;  %v1002_v44 = vmul.f32 %v850_v5, %v1462_v31  ;;  %v51_v56 = vstv %s891_s13  ;;  %v87_v31 = vrot.slane %v916_v14, 1  ;;  %v1087_v9 = vsel %vm131_vm1, %v154_v29, %v155_v36 }
  0x1a   :  { %s919_s21 = sld [smem:[#allocation2 + $0x2c]]  ;;  %v55_v60 = vstv %s893_s14 }
  0x1b   :  { %s929_s22 = sld [smem:[#allocation2 + $0x3]]  ;;  %v43_v51 = vstv %s899_s17  ;;  %v1075_v21 = vsel %vm64_vm0, %v87_v31, %v88_v16  ;;  %v1095_v31 = vsel %vm131_vm1, %v165_v49, %v166_v41 }
  0x1c   :  { %s940_s23 = sld [smem:[#allocation2 + $0x27]]  ;;  %v47_v52 = vstv %s901_s18  ;;  %v1031_v63 = vmul.f32 %v43_v51, %v820_v0 }
  0x1d   :  { %s950_s24 = sld [smem:[#allocation2 + $0x6]]  ;;  %v1034_v2 = vmul.f32 %v47_v52, %v820_v0  ;;  %v104_v10 = vstv %s905_s0 }
  0x1e   :  { %s958_s25 = sld [smem:[#allocation2 + $0x2a]]  ;;  %v115_v11 = vstv %s909_s19 }
  0x1f   :  { %364 = vrot.lane.b32.xlu0 %v850_v5, %s798_s16  ;;  %366 = vrot.lane.b32.xlu1 %v844_v4, %s797_s15  ;;  %s970_s26 = sld [smem:[#allocation2 + $0xc]]  ;;  %v171_v23 = vstv %s913_s20 }
  0x20   :  { %368 = vrot.lane.b32.xlu2 %v850_v5, %s797_s15  ;;  %s986_s27 = sld [smem:[#allocation2 + $0x30]]  ;;  %v182_v26 = vstv %s919_s21 }
  0x21   :  { %s1004_s28 = sld [smem:[#allocation2 + $0xf]]  ;;  %v59_v3 = vstv %s929_s22 }
  0x22   :  { %s1010_s29 = sld [smem:[#allocation2 + $0x33]]  ;;  %v71_v5 = vstv %s940_s23 }
  0x23   :  { %s1020_s30 = sld [smem:[#allocation2 + $0x9]]  ;;  %v1467_v28 = vstv %s950_s24 }
  0x24   :  { %s1026_s3 = sld [smem:[#allocation2 + $0x2d]] }
  0x25   :  { %s1039_s4 = sld [smem:[#allocation2 + $0xe]]  ;;  %v228_v12 = vstv %s970_s26 }
  0x26   :  { %v239_v13 = vstv %s986_s27  ;;  %s1045_s5 = sld [smem:[#allocation2 + $0x32]] }
  0x27   :  { %529 = vrot.lane.b32.xlu0 %v858_v6, %s798_s16  ;;  %531 = vrot.lane.b32.xlu1 %v863_v7, %s798_s16  ;;  %s897_s16 = sld [smem:[#allocation2 + $0x24]]  ;;  %v294_v59 = vstv %s1004_s28 }
  0x28   :  { %533 = vrot.lane.b32.xlu2 %v858_v6, %s797_s15  ;;  %s1050_s6 = sld [smem:[#allocation2 + $0x11]]  ;;  %v305_v58 = vstv %s1010_s29 }
  0x29   :  { %s1056_s7 = sld [smem:[#allocation2 + $0x35]]  ;;  %v204_v50 = vstv %s1020_s30 }
  0x2a   :  { %s1061_s1 = sld [smem:[#allocation2 + $0xa]]  ;;  %v208_v0 = vstv %s1026_s3 }
  0x2b   :  { %s1065_s8 = sld [smem:[#allocation2 + $0x2e]]  ;;  %v272_v18 = vstv %s1039_s4 }
  0x2c   :  { %s1070_s17 = sld [smem:[#allocation2 + $0xb]]  ;;  %v283_v29 = vstv %s1045_s5 }
  0x2d   :  { %v39_v62 = vstv %s897_s16  ;;  %s1082_s18 = sld [smem:[#allocation2 + $0x2f]] }
  0x2e   :  { %v338_v41 = vstv %s1050_s6  ;;  %s1168_s13 = sld [smem:[#allocation2 + $0x36]] }
  0x2f   :  { %535 = vrot.lane.b32.xlu0 %v863_v7, %s797_s15  ;;  %s895_s15 = sld [smem:[#allocation2]] }
  0x30   :  { %s1184_s14 = sld [smem:[#allocation2 + $0x15]] }
  0x31   :  { %s1194_s16 = sld [smem:[#allocation2 + $0x39]] }
  0x32   :  { %s1196_s0 = sld [smem:[#allocation2 + $0x18]] }
  0x33   :  { %s1198_s19 = sld [smem:[#allocation2 + $0x3c]] }
  0x34   :  { %s1254_s20 = sld [smem:[#allocation2 + $0x17]] }
  0x35   :  { %v35_v61 = vstv %s895_s15  ;;  %s1152_s15 = sld [smem:[#allocation2 + $0x12]] }
  0x36   :  { %s1260_s21 = sld [smem:[#allocation2 + $0x3b]] }
  0x37   :  { %s1266_s22 = sld [smem:[#allocation2 + $0x1a]] }
  0x38   :  { %s1268_s23 = sld [smem:[#allocation2 + $0x3e]] }
  0x39   :  { %s1272_s24 = sld [smem:[#allocation2 + $0x13]] }
  0x3a   :  { %s1282_s26 = sld [smem:[#allocation2 + $0x14]] }
  0x3b   :  { %s1284_s27 = sld [smem:[#allocation2 + $0x38]] }
  0x3c   :  { %s1308_s28 = sld [smem:[#allocation2 + $0x1b]] }
  0x3d   :  { %s1312_s29 = sld [smem:[#allocation2 + $0x3f]] }
  0x3e   :  { %s1320_s30 = sld [smem:[#allocation2 + $0x1e]] }
  0x3f   :  { %s1323_s3 = sld [smem:[#allocation2 + $0x42]] }
  0x40   :  { %s1361_s4 = sld [smem:[#allocation2 + $0x40]] }
  0x41   :  { %s1368_s5 = sld [smem:[#allocation2 + $0x1f]] }
  0x42   :  { %s1370_s6 = sld [smem:[#allocation2 + $0x41]] }
  0x62   :  { %v984_v40 = vpop.permute.xlu2 %195 }
  0x63   :  { %v229_v51 = vmul.f32 %v228_v12, %v984_v40  ;;  %v240_v52 = vmul.f32 %v239_v13, %v984_v40  ;;  %v295_v55 = vmul.f32 %v294_v59, %v984_v40  ;;  %v306_v27 = vmul.f32 %v305_v58, %v984_v40 }
  0x64   :  { %v1090_v16 = vmul.f32 %v204_v50, %v984_v40  ;;  %v1098_v32 = vmul.f32 %v208_v0, %v984_v40  ;;  %v349_v40 = vstv %s1056_s7  ;;  %s1374_s7 = sld [smem:[#allocation2 + $0x43]] }
  0x65   :  { %v233_v8 = vrot.slane %v229_v51, 1  ;;  %v244_v19 = vrot.slane %v240_v52, 1  ;;  %v310_v17 = vrot.slane %v306_v27, 2 }
  0x6a   :  { %v198_v15 = vpop.permute.xlu2 %197 }
  0x6b   :  { %v230_v30 = vmul.f32 %v228_v12, %v198_v15  ;;  %v241_v53 = vmul.f32 %v239_v13, %v198_v15  ;;  %v296_v54 = vmul.f32 %v294_v59, %v198_v15  ;;  %v307_v14 = vmul.f32 %v305_v58, %v198_v15 }
  0x6c   :  { %v299_v58 = vrot.slane %v295_v55, 2  ;;  %v212_v55 = vstv %s1061_s1  ;;  %v216_v13 = vstv %s1065_s8  ;;  %s1381_s1 = sld [smem:[#allocation2 + $0x20]] }
  0x6d   :  { %v234_v12 = vrot.slane %v230_v30, 1  ;;  %v245_v47 = vrot.slane %v241_v53, 1  ;;  %v300_v59 = vrot.slane %v296_v54, 2  ;;  %v311_v30 = vrot.slane %v307_v14, 2  ;;  %s1385_s8 = sld [smem:[#allocation2 + $0x44]] }
  0x6f   :  { %v1103_v27 = vsel %vm64_vm0, %v233_v8, %v234_v12  ;;  %v1106_v20 = vsel %vm64_vm0, %v244_v19, %v245_v47  ;;  %v1115_v54 = vsel %vm131_vm1, %v299_v58, %v300_v59  ;;  %v1123_v47 = vsel %vm131_vm1, %v310_v17, %v311_v30 }
  0x70   :  { %v1145_v12 = vmul.f32 %v827_v1, %v212_v55  ;;  %v1148_v58 = vmul.f32 %v827_v1, %v216_v13  ;;  %v220_v59 = vstv %s1070_s17  ;;  %v224_v17 = vstv %s1082_s18  ;;  %s1398_s17 = sld [smem:[#allocation2 + $0x22]] }
  0x71   :  { %v1466_v1 = vrot.slane %v946_v25, 1  ;;  %v1468_v25 = vstv %s958_s25  ;;  %s1276_s25 = sld [smem:[#allocation2 + $0x37]] }
  0x72   :  { %s1407_s18 = sld [smem:[#allocation2 + $0x46]] }
  0x79   :  { %v31_v36 = vpop.permute.xlu1 %30  ;;  %v27_v50 = vpop.permute.xlu0 %26 }
  0x7a   :  { %v36_v49 = vmul.f32 %v35_v61, %v27_v50  ;;  %v40_v53 = vmul.f32 %v39_v62, %v27_v50  ;;  %v105_v57 = vmul.f32 %v104_v10, %v31_v36  ;;  %v116_v8 = vmul.f32 %v115_v11, %v31_v36 }
  0x7b   :  { %v1128_v15 = vmul.f32 %v171_v23, %v31_v36  ;;  %v1132_v61 = vmul.f32 %v182_v26, %v31_v36  ;;  %v60_v62 = vmul.f32 %v59_v3, %v27_v50  ;;  %v72_v0 = vmul.f32 %v71_v5, %v27_v50 }
  0x7c   :  { %v52_v51 = vmul.f32 %v51_v56, %v31_v36  ;;  %v56_v52 = vmul.f32 %v55_v60, %v31_v36  ;;  %v45_v14 = vadd.f32 %v1031_v63, %v36_v49  ;;  %v49_v19 = vadd.f32 %v1034_v2, %v40_v53 }
  0x7d   :  { %v109_v56 = vrot.slane %v105_v57, 1  ;;  %v120_v60 = vrot.slane %v116_v8, 1  ;;  %v1159_v63 = vsel %vm64_vm0, %v255_v45, %v256_v46  ;;  %v1166_v2 = vsel %vm64_vm0, %v1466_v1, %v267_v48 }
  0x7e   :  { %v176_v30 = vrot.slane %v1128_v15, 2  ;;  %v187_v22 = vrot.slane %v1132_v61, 2  ;;  %v65_v24 = vrot.slane %v60_v62, 1  ;;  %v76_v45 = vrot.slane %v72_v0, 1 }
  0x7f   :  { %v127_v36 = vmul.f32 %v1467_v28, %v27_v50  ;;  %v139_v49 = vmul.f32 %v1468_v25, %v27_v50  ;;  %v53_v48 = vadd.f32 %v52_v51, %v45_v14  ;;  %v57_v55 = vadd.f32 %v56_v52, %v49_v19 }
  0x80   :  { %v1469_v0 = vmov %v1467_v28  ;;  %v1470_v50 = vmov %v1468_v25  ;;  %v1472_v25 = vrot.slane %v965_v34, 2 }
  0x81   :  { %v33_v46 = vpop.permute.xlu1 %32  ;;  %v29_v53 = vpop.permute.xlu0 %28  ;;  %v143_v19 = vrot.slane %v139_v49, 2  ;;  %v375_v49 = vstv %s1168_s13  ;;  %s1421_s13 = sld [smem:[#allocation2 + $0x47]] }
  0x82   :  { %v106_v57 = vmul.f32 %v104_v10, %v33_v46  ;;  %v117_v8 = vmul.f32 %v115_v11, %v33_v46  ;;  %v173_v13 = vmul.f32 %v171_v23, %v33_v46  ;;  %v184_v15 = vmul.f32 %v182_v26, %v33_v46 }
  0x83   :  { %v61_v61 = vmul.f32 %v59_v3, %v29_v53  ;;  %v73_v62 = vmul.f32 %v71_v5, %v29_v53  ;;  %v128_v1 = vmul.f32 %v1469_v0, %v29_v53  ;;  %v140_v28 = vmul.f32 %v1470_v50, %v29_v53 }
  0x84   :  { %v110_v51 = vrot.slane %v106_v57, 1  ;;  %v121_v10 = vrot.slane %v117_v8, 1  ;;  %v177_v11 = vrot.slane %v173_v13, 2  ;;  %v188_v23 = vrot.slane %v184_v15, 2 }
  0x85   :  { %v66_v26 = vrot.slane %v61_v61, 1  ;;  %v77_v52 = vrot.slane %v73_v62, 1  ;;  %v133_v14 = vrot.slane %v128_v1, 2  ;;  %v144_v3 = vrot.slane %v140_v28, 2 }
  0x86   :  { %v132_v5 = vrot.slane %v127_v36, 2  ;;  %v1471_v46 = vrot.slane %v968_v35, 2  ;;  %v1473_v57 = vrot.slane %v977_v38, 2  ;;  %v1474_v8 = vrot.slane %v974_v37, 2  ;;  %v363_v37 = vpop.permute.xlu2 %362 }
  0x87   :  { %v67_v15 = vsel %vm64_vm0, %v65_v24, %v66_v26  ;;  %v78_v61 = vsel %vm64_vm0, %v76_v45, %v77_v52  ;;  %v371_v36 = vstv %s1152_s15  ;;  %v111_v35 = vsel %vm64_vm0, %v109_v56, %v110_v51  ;;  %s1417_s15 = sld [smem:[#allocation2 + $0x23]] }
  0x88   :  { %v1205_v53 = vsel %vm131_vm1, %v1472_v25, %v1471_v46  ;;  %v1212_v13 = vsel %vm131_vm1, %v1474_v8, %v1473_v57  ;;  %v122_v34 = vsel %vm64_vm0, %v120_v60, %v121_v10  ;;  %v69_v62 = vadd.f32 %v67_v15, %v53_v48 }
  0x89   :  { %v80_v38 = vadd.f32 %v78_v61, %v57_v55  ;;  %v178_v0 = vsel %vm131_vm1, %v176_v30, %v177_v11  ;;  %v189_v24 = vsel %vm131_vm1, %v187_v22, %v188_v23  ;;  %v134_v45 = vsel %vm131_vm1, %v132_v5, %v133_v14  ;;  %v202_v56 = vpop.permute.xlu1 %201  ;;  %v200_v60 = vpop.permute.xlu0 %199 }
  0x8a   :  { %v145_v1 = vsel %vm131_vm1, %v143_v19, %v144_v3  ;;  %v91_v48 = vadd.f32 %v1075_v21, %v69_v62  ;;  %v1226_v50 = vmul.f32 %v371_v36, %v363_v37  ;;  %v1228_v30 = vmul.f32 %v375_v49, %v363_v37 }
  0x8b   :  { %v102_v55 = vadd.f32 %v1080_v33, %v80_v38  ;;  %v274_v22 = vmul.f32 %v272_v18, %v202_v56  ;;  %v285_v28 = vmul.f32 %v283_v29, %v202_v56  ;;  %v395_v51 = vstv %s1184_s14 }
  0x8c   :  { %v406_v10 = vstv %s1194_s16  ;;  %v113_v11 = vadd.f32 %v111_v35, %v91_v48  ;;  %v1238_v21 = vmul.f32 %v338_v41, %v202_v56  ;;  %v1242_v33 = vmul.f32 %v349_v40, %v202_v56 }
  0x8d   :  { %v124_v23 = vadd.f32 %v122_v34, %v102_v55  ;;  %v273_v26 = vmul.f32 %v272_v18, %v200_v60  ;;  %v284_v52 = vmul.f32 %v283_v29, %v200_v60  ;;  %v461_v14 = vstv %s1196_s0 }
  0x8e   :  { %v472_v3 = vstv %s1198_s19  ;;  %v136_v5 = vadd.f32 %v134_v45, %v113_v11  ;;  %v339_v46 = vmul.f32 %v338_v41, %v200_v60  ;;  %v350_v25 = vmul.f32 %v349_v40, %v200_v60 }
  0x8f   :  { %v147_v19 = vadd.f32 %v145_v1, %v124_v23  ;;  %v278_v57 = vrot.slane %v274_v22, 1  ;;  %v289_v8 = vrot.slane %v285_v28, 1  ;;  %v221_v15 = vmul.f32 %v220_v59, %v200_v60 }
  0x90   :  { %v225_v61 = vmul.f32 %v224_v17, %v200_v60  ;;  %v158_v18 = vadd.f32 %v1087_v9, %v136_v5  ;;  %v344_v36 = vrot.slane %v1238_v21, 2  ;;  %v355_v41 = vrot.slane %v1242_v33, 2 }
  0x91   :  { %v169_v29 = vadd.f32 %v1095_v31, %v147_v19  ;;  %v277_v40 = vrot.slane %v273_v26, 1  ;;  %v288_v49 = vrot.slane %v284_v52, 1  ;;  %v396_v35 = vmul.f32 %v395_v51, %v363_v37  ;;  %v365_v62 = vpop.permute.xlu0 %364 }
  0x92   :  { %v407_v34 = vmul.f32 %v406_v10, %v363_v37  ;;  %v180_v59 = vadd.f32 %v178_v0, %v158_v18  ;;  %v343_v38 = vrot.slane %v339_v46, 2  ;;  %v354_v45 = vrot.slane %v350_v25, 2 }
  0x93   :  { %v191_v17 = vadd.f32 %v189_v24, %v169_v29  ;;  %v462_v9 = vmul.f32 %v461_v14, %v363_v37  ;;  %v473_v1 = vmul.f32 %v472_v3, %v363_v37  ;;  %v397_v31 = vmul.f32 %v395_v51, %v365_v62 }
  0x94   :  { %v408_v56 = vmul.f32 %v406_v10, %v365_v62  ;;  %v206_v60 = vadd.f32 %v1090_v16, %v180_v59  ;;  %v463_v55 = vmul.f32 %v461_v14, %v365_v62  ;;  %v474_v22 = vmul.f32 %v472_v3, %v365_v62  ;;  %v369_v10 = vpop.permute.xlu2 %368 }
  0x95   :  { %v210_v48 = vadd.f32 %v1098_v32, %v191_v17  ;;  %v279_v28 = vsel %vm64_vm0, %v277_v40, %v278_v57  ;;  %v290_v0 = vsel %vm64_vm0, %v288_v49, %v289_v8  ;;  %v400_v24 = vrot.slane %v396_v35, 1  ;;  %v367_v49 = vpop.permute.xlu1 %366 }
  0x96   :  { %v411_v11 = vrot.slane %v407_v34, 1  ;;  %v214_v37 = vadd.f32 %v1145_v12, %v206_v60  ;;  %v466_v32 = vrot.slane %v462_v9, 2  ;;  %v401_v51 = vrot.slane %v397_v31, 1 }
  0x97   :  { %v218_v16 = vadd.f32 %v1148_v58, %v210_v48  ;;  %v412_v23 = vrot.slane %v408_v56, 1  ;;  %v467_v21 = vrot.slane %v463_v55, 2  ;;  %v439_v33 = vstv %s1254_s20 }
  0x98   :  { %v450_v26 = vstv %s1260_s21  ;;  %v222_v52 = vadd.f32 %v221_v15, %v214_v37  ;;  %v477_v3 = vrot.slane %v473_v1, 2  ;;  %v478_v5 = vrot.slane %v474_v22, 2 }
  0x99   :  { %v226_v14 = vadd.f32 %v225_v61, %v218_v16  ;;  %v505_v19 = vstv %s1266_s22  ;;  %v516_v12 = vstv %s1268_s23  ;;  %v441_v46 = vmul.f32 %v439_v33, %v369_v10 }
  0x9a   :  { %v452_v25 = vmul.f32 %v450_v26, %v369_v10  ;;  %v237_v58 = vadd.f32 %v1103_v27, %v222_v52  ;;  %v345_v8 = vsel %vm131_vm1, %v343_v38, %v344_v36  ;;  %v356_v18 = vsel %vm131_vm1, %v354_v45, %v355_v41 }
  0x9b   :  { %v248_v57 = vadd.f32 %v1106_v20, %v226_v14  ;;  %v1293_v15 = vsel %vm64_vm0, %v400_v24, %v401_v51  ;;  %v1296_v61 = vsel %vm64_vm0, %v411_v11, %v412_v23  ;;  %v1299_v29 = vsel %vm131_vm1, %v466_v32, %v467_v21 }
  0x9c   :  { %v507_v27 = vmul.f32 %v505_v19, %v369_v10  ;;  %v259_v40 = vadd.f32 %v1159_v63, %v237_v58  ;;  %v1304_v36 = vsel %vm131_vm1, %v477_v3, %v478_v5  ;;  %v1306_v41 = vmul.f32 %v516_v12, %v369_v10 }
  0x9d   :  { %v270_v20 = vadd.f32 %v1166_v2, %v248_v57  ;;  %v445_v35 = vrot.slane %v441_v46, 1  ;;  %v456_v34 = vrot.slane %v452_v25, 1  ;;  %v379_v62 = vstv %s1272_s24 }
  0x9e   :  { %v383_v59 = vstv %s1276_s25  ;;  %v281_v17 = vadd.f32 %v279_v28, %v259_v40  ;;  %v1475_v38 = vstv %s883_s9  ;;  %v1476_v45 = vstv %s885_s10  ;;  %s1328_s9 = sld [smem:[#allocation2 + $0x21]] }
  0x9f   :  { %v292_v63 = vadd.f32 %v290_v0, %v270_v20  ;;  %v418_v2 = vmul.f32 %v844_v4, %v1475_v38  ;;  %v429_v9 = vmul.f32 %v844_v4, %v1476_v45  ;;  %v511_v1 = vrot.slane %v507_v27, 2  ;;  %s1330_s10 = sld [smem:[#allocation2 + $0x45]] }
  0xa0   :  { %v387_v31 = vstv %s1282_s26  ;;  %v440_v56 = vmul.f32 %v439_v33, %v367_v49  ;;  %v451_v60 = vmul.f32 %v450_v26, %v367_v49  ;;  %v303_v48 = vadd.f32 %v1115_v54, %v281_v17 }
  0xa1   :  { %v314_v55 = vadd.f32 %v1123_v47, %v292_v63  ;;  %v391_v22 = vstv %s1284_s27  ;;  %v422_v28 = vrot.slane %v418_v2, 1  ;;  %v433_v0 = vrot.slane %v429_v9, 1 }
  0xa2   :  { %v444_v24 = vrot.slane %v440_v56, 1  ;;  %v455_v11 = vrot.slane %v451_v60, 1  ;;  %v506_v37 = vmul.f32 %v505_v19, %v367_v49  ;;  %v325_v16 = vadd.f32 %v1205_v53, %v303_v48 }
  0xa3   :  { %v336_v32 = vadd.f32 %v1212_v13, %v314_v55  ;;  %v522_v51 = vrot.slane %v1306_v41, 2  ;;  %v517_v54 = vmul.f32 %v516_v12, %v367_v49  ;;  %v380_v47 = vmul.f32 %v844_v4, %v379_v62 }
  0xa4   :  { %v384_v10 = vmul.f32 %v844_v4, %v383_v59  ;;  %v388_v23 = vmul.f32 %v387_v31, %v367_v49  ;;  %v510_v21 = vrot.slane %v506_v37, 2  ;;  %v347_v33 = vadd.f32 %v345_v8, %v325_v16 }
  0xa5   :  { %v358_v26 = vadd.f32 %v356_v18, %v336_v32  ;;  %v392_v52 = vmul.f32 %v391_v22, %v367_v49  ;;  %v1477_v14 = vstv %s887_s11  ;;  %v1478_v13 = vrot.slane %v982_v39, 1  ;;  %v532_v18 = vpop.permute.xlu1 %531  ;;  %s1353_s11 = sld [smem:[#allocation2 + $0x1c]] }
  0xa6   :  { %v484_v53 = vmul.f32 %v844_v4, %v1477_v14  ;;  %v1479_v5 = vrot.slane %v992_v42, 1  ;;  %v446_v12 = vsel %vm64_vm0, %v444_v24, %v445_v35  ;;  %v457_v46 = vsel %vm64_vm0, %v455_v11, %v456_v34  ;;  %v530_v35 = vpop.permute.xlu0 %529 }
  0xa7   :  { %v424_v3 = vsel %vm64_vm0, %v422_v28, %v1478_v13  ;;  %v373_v25 = vadd.f32 %v1226_v50, %v347_v33  ;;  %v377_v58 = vadd.f32 %v1228_v30, %v358_v26  ;;  %v521_v57 = vrot.slane %v517_v54, 2 }
  0xa8   :  { %v435_v19 = vsel %vm64_vm0, %v433_v0, %v1479_v5  ;;  %v1480_v8 = vstv %s889_s12  ;;  %v1356_v42 = vsel %vm131_vm1, %v510_v21, %v511_v1  ;;  %v538_v27 = vstv %s1308_s28  ;;  %s1364_s12 = sld [smem:[#allocation2 + $0x1d]] }
  0xa9   :  { %v495_v39 = vmul.f32 %v844_v4, %v1480_v8  ;;  %v562_v40 = vstv %s1320_s30  ;;  %v573_v20 = vstv %s1323_s3  ;;  %v381_v50 = vadd.f32 %v380_v47, %v373_v25 }
  0xaa   :  { %v385_v41 = vadd.f32 %v384_v10, %v377_v58  ;;  %v488_v30 = vrot.slane %v484_v53, 2  ;;  %v542_v49 = vstv %s1312_s29  ;;  %v628_v34 = vstv %s1328_s9 }
  0xab   :  { %v639_v4 = vstv %s1330_s10  ;;  %v563_v62 = vmul.f32 %v562_v40, %v530_v35  ;;  %v564_v59 = vmul.f32 %v562_v40, %v532_v18  ;;  %v389_v17 = vadd.f32 %v388_v23, %v381_v50 }
  0xac   :  { %v393_v63 = vadd.f32 %v392_v52, %v385_v41  ;;  %v574_v38 = vmul.f32 %v573_v20, %v530_v35  ;;  %v575_v2 = vmul.f32 %v573_v20, %v532_v18  ;;  %v499_v45 = vrot.slane %v495_v39, 2 }
  0xad   :  { %v567_v9 = vrot.slane %v563_v62, 1  ;;  %v568_v1 = vrot.slane %v564_v59, 1  ;;  %v1372_v31 = vmul.f32 %v628_v34, %v530_v35  ;;  %v404_v56 = vadd.f32 %v1293_v15, %v389_v17 }
  0xae   :  { %v415_v60 = vadd.f32 %v1296_v61, %v393_v63  ;;  %v523_v48 = vsel %vm131_vm1, %v521_v57, %v522_v51  ;;  %v1379_v55 = vmul.f32 %v628_v34, %v532_v18  ;;  %v539_v22 = vmul.f32 %v538_v27, %v530_v35 }
  0xaf   :  { %v578_v28 = vrot.slane %v574_v38, 1  ;;  %v579_v0 = vrot.slane %v575_v2, 1  ;;  %v1383_v24 = vmul.f32 %v639_v4, %v530_v35  ;;  %v426_v11 = vadd.f32 %v424_v3, %v404_v56 }
  0xb0   :  { %v437_v15 = vadd.f32 %v435_v19, %v415_v60  ;;  %v1481_v61 = vrot.slane %v997_v43, 2  ;;  %v543_v16 = vmul.f32 %v542_v49, %v530_v35  ;;  %v1482_v32 = vrot.slane %v1002_v44, 2  ;;  %v534_v19 = vpop.permute.xlu2 %533 }
  0xb1   :  { %v1394_v54 = vsel %vm64_vm0, %v567_v9, %v568_v1  ;;  %v633_v47 = vrot.slane %v1372_v31, 2  ;;  %v546_v10 = vstv %s1353_s11  ;;  %v448_v23 = vadd.f32 %v446_v12, %v426_v11 }
  0xb2   :  { %v490_v37 = vsel %vm131_vm1, %v488_v30, %v1481_v61  ;;  %v501_v51 = vsel %vm131_vm1, %v499_v45, %v1482_v32  ;;  %v459_v21 = vadd.f32 %v457_v46, %v437_v15  ;;  %v634_v43 = vrot.slane %v1379_v55, 2 }
  0xb3   :  { %v550_v33 = vstv %s1361_s4  ;;  %v580_v26 = vsel %vm64_vm0, %v578_v28, %v579_v0  ;;  %v1403_v44 = vmul.f32 %v639_v4, %v532_v18  ;;  %v644_v52 = vrot.slane %v1383_v24, 2 }
  0xb4   :  { %v584_v14 = vstv %s1368_s5  ;;  %v470_v53 = vadd.f32 %v1299_v29, %v448_v23  ;;  %v481_v13 = vadd.f32 %v1304_v36, %v459_v21  ;;  %v547_v3 = vmul.f32 %v858_v6, %v546_v10 }
  0xb5   :  { %v554_v5 = vstv %s1364_s12  ;;  %v551_v12 = vmul.f32 %v858_v6, %v550_v33  ;;  %v585_v46 = vmul.f32 %v858_v6, %v584_v14  ;;  %v586_v25 = vmul.f32 %v863_v7, %v584_v14 }
  0xb6   :  { %v595_v58 = vstv %s1374_s7  ;;  %v492_v57 = vadd.f32 %v490_v37, %v470_v53  ;;  %v503_v29 = vadd.f32 %v501_v51, %v481_v13  ;;  %v558_v39 = vstv %s1370_s6 }
  0xb7   :  { %v596_v36 = vmul.f32 %v858_v6, %v595_v58  ;;  %v597_v8 = vmul.f32 %v863_v7, %v595_v58  ;;  %v555_v18 = vmul.f32 %v554_v5, %v534_v19  ;;  %v606_v27 = vstv %s1381_s1 }
  0xb8   :  { %v617_v40 = vstv %s1385_s8  ;;  %v514_v20 = vadd.f32 %v1356_v42, %v492_v57  ;;  %v525_v50 = vadd.f32 %v523_v48, %v503_v29  ;;  %v589_v41 = vrot.slane %v585_v46, 1  ;;  %v536_v48 = vpop.permute.xlu0 %535 }
  0xb9   :  { %v590_v30 = vrot.slane %v586_v25, 1  ;;  %v600_v49 = vrot.slane %v596_v36, 1  ;;  %v601_v35 = vrot.slane %v597_v8, 1  ;;  %v607_v34 = vmul.f32 %v606_v27, %v534_v19 }
  0xba   :  { %v650_v4 = vstv %s1398_s17  ;;  %v540_v62 = vadd.f32 %v539_v22, %v514_v20  ;;  %v544_v59 = vadd.f32 %v543_v16, %v525_v50  ;;  %v559_v17 = vmul.f32 %v558_v39, %v534_v19 }
  0xbb   :  { %v618_v63 = vmul.f32 %v617_v40, %v534_v19  ;;  %v645_v38 = vrot.slane %v1403_v44, 2  ;;  %v651_v2 = vmul.f32 %v858_v6, %v650_v4  ;;  %v652_v45 = vmul.f32 %v863_v7, %v650_v4 }
  0xbc   :  { %v661_v42 = vstv %s1407_s18  ;;  %v548_v9 = vadd.f32 %v547_v3, %v540_v62  ;;  %v552_v1 = vadd.f32 %v551_v12, %v544_v59  ;;  %v591_v56 = vsel %vm64_vm0, %v589_v41, %v590_v30 }
  0xbd   :  { %v662_v60 = vmul.f32 %v858_v6, %v661_v42  ;;  %v602_v22 = vsel %vm64_vm0, %v600_v49, %v601_v35  ;;  %v611_v28 = vrot.slane %v607_v34, 1  ;;  %v663_v0 = vmul.f32 %v863_v7, %v661_v42 }
  0xbe   :  { %v672_v11 = vstv %s1417_s15  ;;  %v556_v15 = vadd.f32 %v555_v18, %v548_v9  ;;  %v560_v61 = vadd.f32 %v559_v17, %v552_v1  ;;  %v622_v37 = vrot.slane %v618_v63, 1 }
  0xbf   :  { %v683_v16 = vstv %s1421_s13  ;;  %v655_v32 = vrot.slane %v651_v2, 2  ;;  %v656_v51 = vrot.slane %v652_v45, 2  ;;  %v666_v10 = vrot.slane %v662_v60, 2 }
  0xc0   :  { %v608_v23 = vmul.f32 %v606_v27, %v536_v48  ;;  %v571_v21 = vadd.f32 %v1394_v54, %v556_v15  ;;  %v582_v33 = vadd.f32 %v580_v26, %v560_v61  ;;  %v673_v44 = vmul.f32 %v672_v11, %v534_v19 }
  0xc1   :  { %v619_v6 = vmul.f32 %v617_v40, %v536_v48  ;;  %v667_v14 = vrot.slane %v663_v0, 2  ;;  %v684_v53 = vmul.f32 %v683_v16, %v534_v19  ;;  %v674_v3 = vmul.f32 %v672_v11, %v536_v48 }
  0xc2   :  { %v612_v13 = vrot.slane %v608_v23, 1  ;;  %v593_v5 = vadd.f32 %v591_v56, %v571_v21  ;;  %v604_v7 = vadd.f32 %v602_v22, %v582_v33  ;;  %v685_v46 = vmul.f32 %v683_v16, %v536_v48 }
  0xc3   :  { %v623_v12 = vrot.slane %v619_v6, 1  ;;  %v635_v58 = vsel %vm131_vm1, %v633_v47, %v634_v43  ;;  %v646_v54 = vsel %vm131_vm1, %v644_v52, %v645_v38  ;;  %v657_v57 = vsel %vm131_vm1, %v655_v32, %v656_v51 }
  0xc4   :  { %v613_v25 = vsel %vm64_vm0, %v611_v28, %v612_v13  ;;  %v677_v29 = vrot.slane %v673_v44, 2  ;;  %v678_v8 = vrot.slane %v674_v3, 2  ;;  %v668_v39 = vsel %vm131_vm1, %v666_v10, %v667_v14 }
  0xc5   :  { %v615_v26 = vadd.f32 %v613_v25, %v593_v5  ;;  %v624_v19 = vsel %vm64_vm0, %v622_v37, %v623_v12  ;;  %v688_v18 = vrot.slane %v684_v53, 2  ;;  %v689_v27 = vrot.slane %v685_v46, 2 }
  0xc6   :  { %v626_v36 = vadd.f32 %v624_v19, %v604_v7  ;;  %v679_v24 = vsel %vm131_vm1, %v677_v29, %v678_v8 }
  0xc7   :  { %v637_v55 = vadd.f32 %v635_v58, %v615_v26  ;;  %v690_v52 = vsel %vm131_vm1, %v688_v18, %v689_v27 }
  0xc8   :  { %v648_v31 = vadd.f32 %v646_v54, %v626_v36 }
  0xc9   :  { %v659_v40 = vadd.f32 %v657_v57, %v637_v55 }
  0xca   :  { %v670_v47 = vadd.f32 %v668_v39, %v648_v31 }
  0xcb   :  { %v681_v43 = vadd.f32 %v679_v24, %v659_v40 }
  0xcc   :  { %v692_v20 = vadd.f32 %v690_v52, %v670_v47 }
  0xcd   :  { %693 = vst [vmem:[%s1461_s2] sm:$0xff] %v681_v43 }
  0xce   :  { %778 = vst [vmem:[%s1461_s2 + $0x8] sm:$0xff] %v692_v20 }
  0xcf   :  { %700 = vsyncpa [#allocation3], 1 }

</bundles_post_ra>
